<compile_context>
chip_gen: v6e
topology: v6e:2x2x1
jax: 0.10.0
libtpu: 0.0.40
codegen_flags: <defaults>
</compile_context>

<pallas_src>
import jax
import jax.numpy as jnp
from jax import lax
from jax.experimental import pallas as pl
from jax.experimental.pallas import tpu as pltpu

EPS = 1e-5
_SQRT_2_OVER_PI = 0.7978845608028654


def _gelu(x):
    # tanh-form GELU: the tanh lowers to the EUP slot and co-issues with the
    # VPU work, unlike a ~15-op erf polynomial on the (binding) VALU slots.
    # TODO(synk): torch nn.GELU defaults to the exact erf form; the tanh
    # approximation differs by ~1e-3 absolute.
    return 0.5 * x * (1.0 + jnp.tanh(_SQRT_2_OVER_PI * (x + 0.044715 * x * x * x)))


def _parallel():
    # Single grid axis, sharded across TensorCores on v7x (no-op on v5e/v6e).
    return pltpu.CompilerParams(dimension_semantics=("parallel",))


def _pick_tile(m, cap=512):
    # Largest power-of-two row tile <= cap that divides m (>= 8), else full m.
    t = cap
    while t >= 8:
        if m % t == 0:
            return t
        t //= 2
    return m


def _bn_affine(ssum, ssq, count, gamma, beta):
    # Fold training-mode BatchNorm (global batch stats, biased variance) into
    # a per-channel scale/shift: y = x*scale + shift.  Tiny [1,C] math in JAX.
    mean = ssum / count
    var = jnp.maximum(ssq / count - mean * mean, 0.0)
    scale = gamma * lax.rsqrt(var + EPS)
    shift = beta - mean * scale
    return scale, shift


# ----------------------------- kernels ------------------------------------


def _up_proj_kernel(x_ref, w_ref, b_ref, h_ref, sum_ref, ssq_ref):
    # Linear(dim -> scale_dim): bf16 MXU matmul with f32 accumulate, plus
    # per-tile partial sums for the global BatchNorm1d statistics.
    h = jnp.dot(x_ref[...].astype(jnp.bfloat16), w_ref[...],
                preferred_element_type=jnp.float32) + b_ref[...]
    h_ref[...] = h
    s = h.shape[1]
    sum_ref[...] = jnp.sum(h, axis=0).reshape(1, 1, s)
    ssq_ref[...] = jnp.sum(h * h, axis=0).reshape(1, 1, s)


def _conv_pool_kernel(h_ref, sc_ref, sh_ref, w_ref, o_ref, sum_ref, ssq_ref):
    # Fused middle stage for one batch element, fully resident in VMEM:
    #   BN1 (precomputed scale/shift) -> GELU -> 3x3 depthwise conv (zero pad)
    #   -> 3x3/stride-1 max pool (-inf pad) -> partial BN2 stats.
    _, H, W, S = o_ref.shape
    g = _gelu(h_ref[0] * sc_ref[...] + sh_ref[...])              # [H, W, S]

    # W-direction neighbours via XLU rolls + edge masks (no unaligned sublane
    # slices); H-direction neighbours via aligned slices of an H-halo-padded
    # array (H is a major, untiled axis).
    col = lax.broadcasted_iota(jnp.int32, (1, W, S), 1)
    not_first = col >= 1            # reading w-1 is in-bounds
    not_last = col <= W - 2         # reading w+1 is in-bounds
    taps = w_ref[...]                                            # [9, S]

    # ---- depthwise 3x3 conv, zero padding ----
    zrow = jnp.zeros((1, W, S), jnp.float32)
    gp = jnp.concatenate([zrow, g, zrow], axis=0)                # [H+2, W, S]
    gp_l = jnp.where(not_first, pltpu.roll(gp, shift=1, axis=1), 0.0)      # g[., w-1]
    gp_r = jnp.where(not_last, pltpu.roll(gp, shift=W - 1, axis=1), 0.0)   # g[., w+1]
    shifted = (gp_l, gp, gp_r)
    acc = jnp.zeros((H, W, S), jnp.float32)
    for ky in range(3):
        for kx in range(3):
            tap = taps[ky * 3 + kx].reshape(1, 1, S)
            acc = acc + shifted[kx][ky:ky + H] * tap

    # ---- 3x3 / stride-1 max pool, padding=1 (-inf halo) ----
    nrow = jnp.full((1, W, S), -jnp.inf, jnp.float32)
    cp = jnp.concatenate([nrow, acc, nrow], axis=0)              # [H+2, W, S]
    cp_l = jnp.where(not_first, pltpu.roll(cp, shift=1, axis=1), -jnp.inf)
    cp_r = jnp.where(not_last, pltpu.roll(cp, shift=W - 1, axis=1), -jnp.inf)
    shifted_p = (cp_l, cp, cp_r)
    mx = acc                                                     # center tap
    for ky in range(3):
        for kx in range(3):
            if ky == 1 and kx == 1:
                continue
            mx = jnp.maximum(mx, shifted_p[kx][ky:ky + H])

    o_ref[0] = mx
    sum_ref[...] = jnp.sum(mx, axis=(0, 1)).reshape(1, 1, S)
    ssq_ref[...] = jnp.sum(mx * mx, axis=(0, 1)).reshape(1, 1, S)


def _down_proj_kernel(p_ref, sc_ref, sh_ref, w_ref, b_ref, y_ref, sum_ref, ssq_ref):
    # BN2 (precomputed scale/shift) + GELU fused in front of the
    # Linear(scale_dim -> dim) bf16 MXU matmul; partial BN3 stats out.
    a = _gelu(p_ref[...] * sc_ref[...] + sh_ref[...])
    y = jnp.dot(a.astype(jnp.bfloat16), w_ref[...],
                preferred_element_type=jnp.float32) + b_ref[...]
    y_ref[...] = y
    d = y.shape[1]
    sum_ref[...] = jnp.sum(y, axis=0).reshape(1, 1, d)
    ssq_ref[...] = jnp.sum(y * y, axis=0).reshape(1, 1, d)


def _bn_gelu_kernel(y_ref, sc_ref, sh_ref, o_ref):
    # Final BN3 + GELU on a lane-dense (>=128 lane) packed view.
    o_ref[...] = _gelu(y_ref[...] * sc_ref[...] + sh_ref[...])


# ------------------------------ LeFF forward -------------------------------


def leff_forward(x, params, hw):
    """x: [B, N, dim] with N == hw*hw.  Returns [B, N, dim]."""
    B, N, D = x.shape
    S = params["w_up"].shape[1]
    assert N == hw * hw
    M = B * N
    f32 = jnp.float32

    # Cast matmul weights to bf16 once (MXU peak rate); accumulation stays f32.
    w_up = params["w_up"].astype(jnp.bfloat16)
    w_dn = params["w_dn"].astype(jnp.bfloat16)

    tm = _pick_tile(M)
    nt = M // tm

    # --- K1: up_proj matmul + partial BN1 stats (tiled over M) ---
    x2d = x.reshape(M, D)
    h, s1, q1 = pl.pallas_call(
        _up_proj_kernel,
        grid=(nt,),
        in_specs=[
            pl.BlockSpec((tm, D), lambda i: (i, 0)),
            pl.BlockSpec((D, S), lambda i: (0, 0)),     # untiled full-block weight
            pl.BlockSpec((1, S), lambda i: (0, 0)),
        ],
        out_specs=[
            pl.BlockSpec((tm, S), lambda i: (i, 0)),
            pl.BlockSpec((1, 1, S), lambda i: (i, 0, 0)),
            pl.BlockSpec((1, 1, S), lambda i: (i, 0, 0)),
        ],
        out_shape=(
            jax.ShapeDtypeStruct((M, S), f32),
            jax.ShapeDtypeStruct((nt, 1, S), f32),
            jax.ShapeDtypeStruct((nt, 1, S), f32),
        ),
        compiler_params=_parallel(),
    )(x2d, w_up, params["b_up"])
    sc1, sh1 = _bn_affine(jnp.sum(s1, axis=0), jnp.sum(q1, axis=0),
                          float(M), params["g1"], params["be1"])

    # --- K2: fused BN1+GELU -> dwconv -> maxpool (+ partial BN2 stats) ---
    h4 = h.reshape(B, hw, hw, S)                         # NHWC, C on lanes
    pooled, s2, q2 = pl.pallas_call(
        _conv_pool_kernel,
        grid=(B,),
        in_specs=[
            pl.BlockSpec((1, hw, hw, S), lambda b: (b, 0, 0, 0)),
            pl.BlockSpec((1, S), lambda b: (0, 0)),
            pl.BlockSpec((1, S), lambda b: (0, 0)),
            pl.BlockSpec((9, S), lambda b: (0, 0)),
        ],
        out_specs=[
            pl.BlockSpec((1, hw, hw, S), lambda b: (b, 0, 0, 0)),
            pl.BlockSpec((1, 1, S), lambda b: (b, 0, 0)),
            pl.BlockSpec((1, 1, S), lambda b: (b, 0, 0)),
        ],
        out_shape=(
            jax.ShapeDtypeStruct((B, hw, hw, S), f32),
            jax.ShapeDtypeStruct((B, 1, S), f32),
            jax.ShapeDtypeStruct((B, 1, S), f32),
        ),
        compiler_params=_parallel(),
    )(h4, sc1, sh1, params["w_dw"])
    sc2, sh2 = _bn_affine(jnp.sum(s2, axis=0), jnp.sum(q2, axis=0),
                          float(M), params["g2"], params["be2"])

    # --- K3: BN2+GELU fused into down_proj matmul + partial BN3 stats ---
    p2d = pooled.reshape(M, S)
    y_pre, s3, q3 = pl.pallas_call(
        _down_proj_kernel,
        grid=(nt,),
        in_specs=[
            pl.BlockSpec((tm, S), lambda i: (i, 0)),
            pl.BlockSpec((1, S), lambda i: (0, 0)),
            pl.BlockSpec((1, S), lambda i: (0, 0)),
            pl.BlockSpec((S, D), lambda i: (0, 0)),
            pl.BlockSpec((1, D), lambda i: (0, 0)),
        ],
        out_specs=[
            pl.BlockSpec((tm, D), lambda i: (i, 0)),
            pl.BlockSpec((1, 1, D), lambda i: (i, 0, 0)),
            pl.BlockSpec((1, 1, D), lambda i: (i, 0, 0)),
        ],
        out_shape=(
            jax.ShapeDtypeStruct((M, D), f32),
            jax.ShapeDtypeStruct((nt, 1, D), f32),
            jax.ShapeDtypeStruct((nt, 1, D), f32),
        ),
        compiler_params=_parallel(),
    )(p2d, sc2, sh2, w_dn, params["b_dn"])
    sc3, sh3 = _bn_affine(jnp.sum(s3, axis=0), jnp.sum(q3, axis=0),
                          float(M), params["g3"], params["be3"])

    # --- K4: final BN3+GELU on a lane-dense packed view (last dim >= 128) ---
    f = 1
    if D < 128 and 128 % D == 0 and M % (128 // D) == 0:
        f = 128 // D
    yp = y_pre.reshape(M // f, f * D)          # free reshape, channel pattern tiles
    sc3t = jnp.tile(sc3, (1, f))
    sh3t = jnp.tile(sh3, (1, f))
    tr = _pick_tile(M // f)
    y = pl.pallas_call(
        _bn_gelu_kernel,
        grid=((M // f) // tr,),
        in_specs=[
            pl.BlockSpec((tr, f * D), lambda i: (i, 0)),
            pl.BlockSpec((1, f * D), lambda i: (0, 0)),
            pl.BlockSpec((1, f * D), lambda i: (0, 0)),
        ],
        out_specs=pl.BlockSpec((tr, f * D), lambda i: (i, 0)),
        out_shape=jax.ShapeDtypeStruct((M // f, f * D), f32),
        compiler_params=_parallel(),
    )(yp, sc3t, sh3t)
    return y.reshape(B, N, D)


def init_leff_params(key, dim, scale):
    """Deterministic synthetic parameters (shapes follow LeFF.__init__)."""
    s_dim = dim * scale
    ks = jax.random.split(key, 10)
    n = jax.random.normal

    def ones_ish(k, c):
        return 1.0 + 0.1 * n(k, (1, c), jnp.float32)

    return {
        # Linear(dim, scale_dim): weight stored as [in, out] (= torch weight.T)
        "w_up": n(ks[0], (dim, s_dim), jnp.float32) / jnp.sqrt(dim),
        "b_up": 0.1 * n(ks[1], (1, s_dim), jnp.float32),
        "g1": ones_ish(ks[2], s_dim),
        "be1": 0.1 * n(ks[3], (1, s_dim), jnp.float32),
        # depthwise Conv2d weight: torch [S,1,3,3] -> [9, S] (ky*3+kx major)
        "w_dw": n(ks[4], (9, s_dim), jnp.float32) / 3.0,
        "g2": ones_ish(ks[5], s_dim),
        "be2": 0.1 * n(ks[6], (1, s_dim), jnp.float32),
        # Linear(scale_dim, dim)
        "w_dn": n(ks[7], (s_dim, dim), jnp.float32) / jnp.sqrt(s_dim),
        "b_dn": 0.1 * n(ks[8], (1, dim), jnp.float32),
        "g3": ones_ish(ks[9], dim),
        "be3": jnp.zeros((1, dim), jnp.float32),
    }


if __name__ == "__main__":
    # Small shapes consistent with the module: dim=32, scale=4 -> scale_dim=128,
    # hw=8 -> seq len N=64, batch B=2.
    dim, scale, hw, B = 32, 4, 8, 2
    N = hw * hw

    key = jax.random.PRNGKey(0)
    kx, kp = jax.random.split(key)
    x = jax.random.normal(kx, (B, N, dim), jnp.float32)
    params = init_leff_params(kp, dim, scale)

    y = leff_forward(x, params, hw)
    y = jax.block_until_ready(y)
    assert y.shape == (B, N, dim) and y.dtype == jnp.float32
    assert bool(jnp.all(jnp.isfinite(y)))
    print("KERNEL_OK")
</pallas_src>

<mosaic_0001>
module attributes {stable_mosaic.version = 11 : i64} {
  func.func @_up_proj_kernel(%arg0: i32, %arg1: memref<128x32xf32, #tpu.memory_space<vmem>>, %arg2: memref<32x128xbf16, #tpu.memory_space<vmem>>, %arg3: memref<1x128xf32, #tpu.memory_space<vmem>>, %arg4: memref<128x128xf32, #tpu.memory_space<vmem>>, %arg5: memref<1x1x128xf32, #tpu.memory_space<vmem>>, %arg6: memref<1x1x128xf32, #tpu.memory_space<vmem>>) attributes {dimension_semantics = [#tpu.dimension_semantics<parallel>], iteration_bounds = array<i64: 1>, scalar_prefetch = 0 : i64, scratch_operands = 0 : i64, tpu.core_type = #tpu.core_type<tc>, window_params = [{transform_indices = @transform_0, window_bounds = array<i64: 128, 32>}, {pipeline_mode = #tpu.pipeline_mode<synchronous>, transform_indices = @transform_1, window_bounds = array<i64: 32, 128>}, {pipeline_mode = #tpu.pipeline_mode<synchronous>, transform_indices = @transform_2, window_bounds = array<i64: 1, 128>}, {transform_indices = @transform_3, window_bounds = array<i64: 128, 128>}, {transform_indices = @transform_4, window_bounds = array<i64: 1, 1, 128>}, {transform_indices = @transform_5, window_bounds = array<i64: 1, 1, 128>}]} {
    %c0 = arith.constant 0 : index
    %c0_0 = arith.constant 0 : index
    %0 = vector.load %arg1[%c0, %c0_0] : memref<128x32xf32, #tpu.memory_space<vmem>>, vector<128x32xf32>
    %1 = arith.truncf %0 : vector<128x32xf32> to vector<128x32xbf16>
    %c0_1 = arith.constant 0 : index
    %c0_2 = arith.constant 0 : index
    %2 = vector.load %arg2[%c0_1, %c0_2] : memref<32x128xbf16, #tpu.memory_space<vmem>>, vector<32x128xbf16>
    %cst = arith.constant dense<0.000000e+00> : vector<128x128xf32>
    %3 = tpu.matmul %1, %2, %cst {dimension_numbers = #tpu.dot_dimension_numbers<[1], [0], [0], [1], [0, 0, 1, 1], [], []>} : vector<128x32xbf16>, vector<32x128xbf16>, vector<128x128xf32> -> vector<128x128xf32>
    %c0_3 = arith.constant 0 : index
    %c0_4 = arith.constant 0 : index
    %4 = vector.load %arg3[%c0_3, %c0_4] : memref<1x128xf32, #tpu.memory_space<vmem>>, vector<1x128xf32>
    %5 = vector.broadcast %4 : vector<1x128xf32> to vector<128x128xf32>
    %6 = arith.addf %3, %5 : vector<128x128xf32>
    %c0_5 = arith.constant 0 : index
    %c0_6 = arith.constant 0 : index
    %7 = vector.load %arg4[%c0_5, %c0_6] : memref<128x128xf32, #tpu.memory_space<vmem>>, vector<128x128xf32>
    tpu.vector_store %arg4[%c0_5, %c0_6], %6 {strides = array<i32>} : memref<128x128xf32, #tpu.memory_space<vmem>>, vector<128x128xf32>,
    %cst_7 = arith.constant dense<0.000000e+00> : vector<128xf32>
    %8 = vector.multi_reduction <add>, %6, %cst_7 [0] : vector<128x128xf32> to vector<128xf32>
    %9 = vector.shape_cast %8 : vector<128xf32> to vector<1x1x128xf32>
    %c0_8 = arith.constant 0 : index
    %c0_9 = arith.constant 0 : index
    %c0_10 = arith.constant 0 : index
    %10 = vector.load %arg5[%c0_8, %c0_9, %c0_10] : memref<1x1x128xf32, #tpu.memory_space<vmem>>, vector<1x1x128xf32>
    tpu.vector_store %arg5[%c0_8, %c0_9, %c0_10], %9 {strides = array<i32>} : memref<1x1x128xf32, #tpu.memory_space<vmem>>, vector<1x1x128xf32>,
    %11 = arith.mulf %6, %6 : vector<128x128xf32>
    %cst_11 = arith.constant dense<0.000000e+00> : vector<128xf32>
    %12 = vector.multi_reduction <add>, %11, %cst_11 [0] : vector<128x128xf32> to vector<128xf32>
    %13 = vector.shape_cast %12 : vector<128xf32> to vector<1x1x128xf32>
    %c0_12 = arith.constant 0 : index
    %c0_13 = arith.constant 0 : index
    %c0_14 = arith.constant 0 : index
    %14 = vector.load %arg6[%c0_12, %c0_13, %c0_14] : memref<1x1x128xf32, #tpu.memory_space<vmem>>, vector<1x1x128xf32>
    tpu.vector_store %arg6[%c0_12, %c0_13, %c0_14], %13 {strides = array<i32>} : memref<1x1x128xf32, #tpu.memory_space<vmem>>, vector<1x1x128xf32>,
    return
  }
  func.func @transform_0(%arg0: i32) -> (i32, i32) {
    %c0_i32 = arith.constant 0 : i32
    %c0_i32_0 = arith.constant 0 : i32
    return %arg0, %c0_i32 : i32, i32
  }
  func.func @transform_1(%arg0: i32) -> (i32, i32) {
    %c0_i32 = arith.constant 0 : i32
    %c0_i32_0 = arith.constant 0 : i32
    %c0_i32_1 = arith.constant 0 : i32
    return %c0_i32, %c0_i32_0 : i32, i32
  }
  func.func @transform_2(%arg0: i32) -> (i32, i32) {
    %c0_i32 = arith.constant 0 : i32
    %c0_i32_0 = arith.constant 0 : i32
    %c0_i32_1 = arith.constant 0 : i32
    return %c0_i32, %c0_i32_0 : i32, i32
  }
  func.func @transform_3(%arg0: i32) -> (i32, i32) {
    %c0_i32 = arith.constant 0 : i32
    %c0_i32_0 = arith.constant 0 : i32
    return %arg0, %c0_i32 : i32, i32
  }
  func.func @transform_4(%arg0: i32) -> (i32, i32, i32) {
    %c0_i32 = arith.constant 0 : i32
    %c0_i32_0 = arith.constant 0 : i32
    %c0_i32_1 = arith.constant 0 : i32
    return %arg0, %c0_i32, %c0_i32_0 : i32, i32, i32
  }
  func.func @transform_5(%arg0: i32) -> (i32, i32, i32) {
    %c0_i32 = arith.constant 0 : i32
    %c0_i32_0 = arith.constant 0 : i32
    %c0_i32_1 = arith.constant 0 : i32
    return %arg0, %c0_i32, %c0_i32_0 : i32, i32, i32
  }
}

</mosaic_0001>

<bundles_post_ra>
// kernel: tpu_custom_call.1
= control target key start
LH: loop header
LB: loop body
LE: loop exit
PB: predicated region body
PF: predicated region fallthrough
CT: control target
= control target key end

     0   :  { %11 = vsyncpa [#allocation3], 0  ;;  %vm67_vm0 = vcmask 261120   ;;  %s563_s0 = inlined_call_operand.vmem [shape: f32[128,32], index: 0, kind: input, shape index: {}]   ;;  %s564_s1 = inlined_call_operand.vmem [shape: bf16[32,128], index: 1, kind: input, shape index: {}]   ;;  %s565_s2 = inlined_call_operand.vmem [shape: f32[1,128], index: 2, kind: input, shape index: {}]   ;;  %s566_s3 = inlined_call_operand.hbm [shape: f32[128,128], index: 3, kind: output, shape index: {0}]   ;;  %s567_s4 = inlined_call_operand.hbm [shape: f32[1,1,128], index: 4, kind: output, shape index: {1}]   ;;  %s568_s5 = inlined_call_operand.hbm [shape: f32[1,1,128], index: 5, kind: output, shape index: {2}]  }
   0x1   :  { %v358_v0 = vld [vmem:[%s564_s1 + $0x8] sm:$0xff]   ;;  %v359_v1 = vld [vmem:[%s564_s1] sm:$0xff]   ;;  %v22_v5 = vld [vmem:[%s563_s0 + $0x10] sm:$0xff] }
   0x2   :  { %329 = vmatprep.subr.bf16.mxu0 %v358_v0  ;;  %v20_v2 = vld [vmem:[%s563_s0] sm:$0xff]  ;;  %v21_v3 = vld [vmem:[%s563_s0 + $0x8] sm:$0xff]  ;;  %349 = vmatprep.subr.bf16.mxu1 %v358_v0  ;;  %v23_v6 = vld [vmem:[%s563_s0 + $0x18] sm:$0xff] }
   0x3   :  { %330 = vmatpush3.bf16.msra.mxu0 %v358_v0  ;;  %v36_v4 = vpack.c.bf16 %v21_v3, %v20_v2  ;;  %351 = vmatpush3.bf16.msra.mxu1 %v358_v0  ;;  %v24_v7 = vld [vmem:[%s563_s0 + $0x20] sm:$0xff]  ;;  %v25_v8 = vld [vmem:[%s563_s0 + $0x28] sm:$0xff]  ;;  %v30_v11 = vld [vmem:[%s563_s0 + $0x50] sm:$0xff]  ;;  %v37_v13 = vpack.c.bf16 %v23_v6, %v22_v5 }
   0x4   :  { %331 = vmatprep.subr.bf16.mxu0 %v359_v1  ;;  %350 = vmatprep.subr.bf16.mxu1 %v359_v1  ;;  %v28_v9 = vld [vmem:[%s563_s0 + $0x40] sm:$0xff]  ;;  %v29_v10 = vld [vmem:[%s563_s0 + $0x48] sm:$0xff]  ;;  %v31_v12 = vld [vmem:[%s563_s0 + $0x58] sm:$0xff]  ;;  %v38_v18 = vpack.c.bf16 %v25_v8, %v24_v7 }
   0x5   :  { %333 = vmatprep.mubr.msk.bf16.mxu0 %vm67_vm0, %v36_v4  ;;  %v40_v14 = vpack.c.bf16 %v29_v10, %v28_v9  ;;  %v41_v15 = vpack.c.bf16 %v31_v12, %v30_v11  ;;  %v32_v16 = vld [vmem:[%s563_s0 + $0x60] sm:$0xff]  ;;  %v33_v17 = vld [vmem:[%s563_s0 + $0x68] sm:$0xff] }
   0x6   :  { %v42_v19 = vpack.c.bf16 %v33_v17, %v32_v16 }
   0x7   :  { %332 = vmatpush3.bf16.msra.mxu0 %v359_v1  ;;  %352 = vmatpush3.bf16.msra.mxu1 %v359_v1 }
   0x8   :  { %12 = vsyncpa [#allocation5], 0  ;;  %341 = vmatprep.mubr.msk.bf16.mxu1 %vm67_vm0, %v40_v14  ;;  %v26_v20 = vld [vmem:[%s563_s0 + $0x30] sm:$0xff]  ;;  %v27_v21 = vld [vmem:[%s563_s0 + $0x38] sm:$0xff] }
   0x9   :  { %v34_v22 = vld [vmem:[%s563_s0 + $0x70] sm:$0xff]  ;;  %v35_v23 = vld [vmem:[%s563_s0 + $0x78] sm:$0xff]  ;;  %v39_v24 = vpack.c.bf16 %v27_v21, %v26_v20  ;;  %v308_v26 = vld [vmem:[%s565_s2] ss:$0 sm:$0xff]  ;;  %s424_s0 = smov [#allocation2]  }
   0xa   :  { %334 = vmatmul.mubr.msk.bf16.vlgmr.msra.gmra.mxu0 %vm67_vm0, %v37_v13  ;;  %342 = vmatmul.mubr.msk.bf16.vlgmr.msra.gmra.mxu1 %vm67_vm0, %v41_v15  ;;  %v43_v25 = vpack.c.bf16 %v35_v23, %v34_v22  ;;  %s270_s2 = sshll.u32 %s424_s0, 4  ;;  %s271_s2 = int_to_ptr.vmem [resolvable:$true] %s270_s2 }
   0xb   :  { %337 = vmatprep.mubr.msk.bf16.mxu0 %vm67_vm0, %v38_v18  ;;  %345 = vmatprep.mubr.msk.bf16.mxu1 %vm67_vm0, %v42_v19  ;;  %s360_s1 = scalar_lea.vmem %s271_s2, 2048  ;;  %p365_p1 = scmp.lt.s32.totalorder %s271_s2, %s271_s2 }
   0xc   :  { %p361_p0 = scmp.ne.s32.totalorder %s271_s2, %s360_s1  ;;  %p366_p2 = scmp.lt.s32.totalorder %s360_s1, %s360_s1 }
   0xe   :  { %p367_p3 = por %p366_p2, %p365_p1 }
  0x10   :  { %p368_p4 = pnand %p367_p3, %p361_p0 }
  0x12   :  { %338 = vmatmul.mubr.msk.bf16.gmra.mxu0 %vm67_vm0, %v39_v24  ;;  %346 = vmatmul.mubr.msk.bf16.gmra.mxu1 %vm67_vm0, %v43_v25 }
  0xca   :  { %v335_v27 = vpop.f32.mrf.mxu0  ;;  %v343_v28 = vpop.f32.mrf.mxu1 }
  0xcb   :  { %v135_v29 = vadd.f32 %v335_v27, %v308_v26  ;;  %v524_v30 = vadd.f32 %v343_v28, %v308_v26 }
  0xcc   :  { %v126_v31 = vpop.f32.mrf.mxu0  ;;  %v158_v32 = vpop.f32.mrf.mxu1 }
  0xcd   :  { %191 = vst [vmem:[#allocation2 + $0x10] sm:$0xff] %v135_v29  ;;  %v127_v33 = vadd.f32 %v308_v26, %v126_v31  ;;  %199 = vst [vmem:[#allocation2 + $0x50] sm:$0xff] %v524_v30  ;;  %v527_v34 = vadd.f32 %v308_v26, %v158_v32  ;;  %v229_v52 = vmul.f32 %v135_v29, %v135_v29 }
  0xce   :  { %v336_v35 = vpop.f32.mrf.mxu0  ;;  %v344_v36 = vpop.f32.mrf.mxu1 }
  0xcf   :  { %189 = vst [vmem:[#allocation2] sm:$0xff] %v127_v33  ;;  %v138_v37 = vadd.f32 %v336_v35, %v308_v26  ;;  %197 = vst [vmem:[#allocation2 + $0x40] sm:$0xff] %v527_v34  ;;  %v530_v38 = vadd.f32 %v344_v36, %v308_v26  ;;  %v227_v45 = vmul.f32 %v127_v33, %v127_v33 }
  0xd0   :  { %v129_v39 = vpop.f32.mrf.mxu0  ;;  %v161_v40 = vpop.f32.mrf.mxu1 }
  0xd1   :  { %192 = vst [vmem:[#allocation2 + $0x18] sm:$0xff] %v138_v37  ;;  %v130_v41 = vadd.f32 %v308_v26, %v129_v39  ;;  %200 = vst [vmem:[#allocation2 + $0x58] sm:$0xff] %v530_v38  ;;  %v533_v42 = vadd.f32 %v308_v26, %v161_v40  ;;  %v230_v59 = vmul.f32 %v138_v37, %v138_v37 }
  0xd2   :  { %v339_v43 = vpop.f32.mrf.mxu0  ;;  %v347_v44 = vpop.f32.mrf.mxu1 }
  0xd3   :  { %190 = vst [vmem:[#allocation2 + $0x8] sm:$0xff] %v130_v41  ;;  %v205_v46 = vadd.f32 %v130_v41, %v127_v33  ;;  %v228_v47 = vmul.f32 %v130_v41, %v130_v41  ;;  %v151_v48 = vadd.f32 %v339_v43, %v308_v26  ;;  %198 = vst [vmem:[#allocation2 + $0x48] sm:$0xff] %v533_v42 }
  0xd4   :  { %v142_v49 = vpop.f32.mrf.mxu0  ;;  %v536_v50 = vadd.f32 %v347_v44, %v308_v26  ;;  %v174_v51 = vpop.f32.mrf.mxu1 }
  0xd5   :  { %v206_v53 = vadd.f32 %v205_v46, %v135_v29  ;;  %v243_v54 = vadd.f32 %v228_v47, %v227_v45  ;;  %195 = vst [vmem:[#allocation2 + $0x30] sm:$0xff] %v151_v48  ;;  %v143_v55 = vadd.f32 %v308_v26, %v142_v49  ;;  %v175_v57 = vadd.f32 %v308_v26, %v174_v51 }
  0xd6   :  { %v340_v56 = vpop.f32.mrf.mxu0  ;;  %203 = vst [vmem:[#allocation2 + $0x70] sm:$0xff] %v536_v50  ;;  %v348_v58 = vpop.f32.mrf.mxu1  ;;  %v233_v10 = vmul.f32 %v151_v48, %v151_v48 }
  0xd7   :  { %v244_v60 = vadd.f32 %v243_v54, %v229_v52  ;;  %193 = vst [vmem:[#allocation2 + $0x20] sm:$0xff] %v143_v55  ;;  %v207_v61 = vadd.f32 %v206_v53, %v138_v37  ;;  %v154_v62 = vadd.f32 %v340_v56, %v308_v26  ;;  %201 = vst [vmem:[#allocation2 + $0x60] sm:$0xff] %v175_v57 }
  0xd8   :  { %v145_v63 = vpop.f32.mrf.mxu0  ;;  %v186_v0 = vadd.f32 %v348_v58, %v308_v26  ;;  %v177_v1 = vpop.f32.mrf.mxu1  ;;  %v231_v3 = vmul.f32 %v143_v55, %v143_v55 }
  0xd9   :  { %v208_v2 = vadd.f32 %v207_v61, %v143_v55  ;;  %v245_v4 = vadd.f32 %v244_v60, %v230_v59  ;;  %196 = vst [vmem:[#allocation2 + $0x38] sm:$0xff] %v154_v62  ;;  %v146_v5 = vadd.f32 %v308_v26, %v145_v63  ;;  %v178_v6 = vadd.f32 %v308_v26, %v177_v1 }
  0xda   :  { %204 = vst [vmem:[#allocation2 + $0x78] sm:$0xff] %v186_v0 }
  0xdb   :  { %v246_v7 = vadd.f32 %v245_v4, %v231_v3  ;;  %194 = vst [vmem:[#allocation2 + $0x28] sm:$0xff] %v146_v5  ;;  %v209_v8 = vadd.f32 %v208_v2, %v146_v5  ;;  %v232_v9 = vmul.f32 %v146_v5, %v146_v5  ;;  %202 = vst [vmem:[#allocation2 + $0x68] sm:$0xff] %v178_v6 }
  0xdd   :  { %v210_v11 = vadd.f32 %v209_v8, %v151_v48  ;;  %v247_v12 = vadd.f32 %v246_v7, %v232_v9 }
  0xde   :  { %371 = shalt.err (!%p368_p4)
}
  0xdf   :  { %s425_s30 = smov 128   ;;  %s426_s6 = smov 8   ;;  %v234_v13 = vmul.f32 %v154_v62, %v154_v62  ;;  %v248_v14 = vadd.f32 %v247_v12, %v233_v10  ;;  %v211_v15 = vadd.f32 %v210_v11, %v154_v62  ;;  %v235_v16 = vmul.f32 %v527_v34, %v527_v34 }
  0xe0   :  { %276 = dma.vmem_to_hbm [thread:$0]  %s271_s2, 2048, %s566_s3, [#allocation3], %s425_s30, %s425_s30, %s426_s6   ;;  %v236_v20 = vmul.f32 %v533_v42, %v533_v42  ;;  %v237_v22 = vmul.f32 %v524_v30, %v524_v30  ;;  %v238_v25 = vmul.f32 %v530_v38, %v530_v38  ;;  %v239_v29 = vmul.f32 %v175_v57, %v175_v57 }
  0xe1   :  { %v212_v17 = vadd.f32 %v211_v15, %v527_v34  ;;  %v249_v18 = vadd.f32 %v248_v14, %v234_v13  ;;  %v240_v34 = vmul.f32 %v178_v6, %v178_v6  ;;  %v241_v35 = vmul.f32 %v536_v50, %v536_v50  ;;  %s427_s3 = smov [#allocation4]   ;;  %s428_s10 = smov [#allocation6]  }
  0xe2   :  { %s283_s9 = sshll.u32 %s427_s3, 4  ;;  %s293_s11 = sshll.u32 %s428_s10, 4  ;;  %s284_s9 = int_to_ptr.vmem [resolvable:$true] %s283_s9  ;;  %s294_s11 = int_to_ptr.vmem [resolvable:$true] %s293_s11 }
  0xe3   :  { %v213_v19 = vadd.f32 %v212_v17, %v533_v42  ;;  %v250_v21 = vadd.f32 %v249_v18, %v235_v16  ;;  %s380_s12 = scalar_lea.vmem %s284_s9, 16  ;;  %s384_s13 = scalar_lea.vmem %s284_s9, 32 }
  0xe4   :  { %p381_p5 = scmp.ne.s32.totalorder %s284_s9, %s380_s12  ;;  %p385_p6 = scmp.lt.s32.totalorder %s284_s9, %s284_s9 }
  0xe5   :  { %v214_v23 = vadd.f32 %v213_v19, %v524_v30  ;;  %v251_v24 = vadd.f32 %v250_v21, %v236_v20  ;;  %v242_v30 = vmul.f32 %v186_v0, %v186_v0  ;;  %p386_p7 = scmp.lt.s32.totalorder %s384_s13, %s380_s12 }
  0xe7   :  { %v252_v26 = vadd.f32 %v251_v24, %v237_v22  ;;  %v215_v27 = vadd.f32 %v214_v23, %v530_v38  ;;  %p387_p8 = por %p386_p7, %p385_p6 }
  0xe9   :  { %v216_v28 = vadd.f32 %v215_v27, %v175_v57  ;;  %v253_v31 = vadd.f32 %v252_v26, %v238_v25  ;;  %p388_p9 = pnand %p387_p8, %p381_p5 }
  0xeb   :  { %v254_v32 = vadd.f32 %v253_v31, %v239_v29  ;;  %v217_v33 = vadd.f32 %v216_v28, %v178_v6 }
  0xed   :  { %v218_v36 = vadd.f32 %v217_v33, %v536_v50  ;;  %v255_v37 = vadd.f32 %v254_v32, %v240_v34 }
  0xef   :  { %v256_v39 = vadd.f32 %v255_v37, %v241_v35  ;;  %v219_v40 = vadd.f32 %v218_v36, %v186_v0 }
  0xf1   :  { %v220_v41 = vrot.slane %v219_v40, 4  ;;  %v257_v42 = vadd.f32 %v256_v39, %v242_v30 }
  0xf3   :  { %v221_v43 = vadd.f32 %v220_v41, %v219_v40  ;;  %v258_v44 = vrot.slane %v257_v42, 4 }
  0xf5   :  { %v222_v38 = vrot.slane %v221_v43, 2  ;;  %v259_v45 = vadd.f32 %v258_v44, %v257_v42 }
  0xf7   :  { %v223_v46 = vadd.f32 %v222_v38, %v221_v43  ;;  %v260_v47 = vrot.slane %v259_v45, 2 }
  0xf9   :  { %v224_v48 = vrot.slane %v223_v46, 1  ;;  %v261_v49 = vadd.f32 %v260_v47, %v259_v45 }
  0xfb   :  { %v225_v51 = vadd.f32 %v224_v48, %v223_v46  ;;  %v262_v50 = vrot.slane %v261_v49, 1 }
  0xfd   :  { %226 = vst [vmem:[#allocation4] sm:$0x1] %v225_v51  ;;  %v263_v52 = vadd.f32 %v262_v50, %v261_v49 }
  0xfe   :  { %391 = shalt.err (!%p388_p9)
}
  0xff   :  { %286 = dma.vmem_to_hbm [thread:$0]  %s284_s9, 16, %s567_s4, [#allocation5]   ;;  %264 = vst [vmem:[#allocation6] sm:$0x1] %v263_v52 }
 0x100   :  { %s400_s16 = scalar_lea.vmem %s294_s11, 16  ;;  %s404_s17 = scalar_lea.vmem %s294_s11, 32 }
 0x101   :  { %p401_p10 = scmp.ne.s32.totalorder %s294_s11, %s400_s16  ;;  %p405_p11 = scmp.lt.s32.totalorder %s294_s11, %s294_s11 }
 0x102   :  { %p406_p12 = scmp.lt.s32.totalorder %s404_s17, %s400_s16 }
 0x104   :  { %p407_p13 = por %p406_p12, %p405_p11 }
 0x106   :  { %p408_p0 = pnand %p407_p13, %p401_p10 }
 0x108   :  { %411 = shalt.err (!%p408_p0)
}
 0x109   :  { %296 = dma.vmem_to_hbm [thread:$0]  %s294_s11, 16, %s568_s5, [#allocation5]  }
 0x10a   :  { %420 = dma.done.wait [#allocation3], 2048  }
 0x10b   :  { %421 = vsyncadd [#allocation3], 4294965248 }
 0x10c   :  { %422 = dma.done.wait [#allocation5], 32  }
 0x10d   :  { %423 = vsyncadd [#allocation5], 4294967264 }
 0x10e   :  { %306 = vsyncpa [#allocation3], 1 }
 0x10f   :  { %307 = vsyncpa [#allocation5], 1 }

</bundles_post_ra>
